<compile_context>
chip_gen: v6e
topology: v6e:2x2x1
jax: 0.10.0
libtpu: 0.0.40
codegen_flags: <defaults>
</compile_context>

<pallas_src>
import functools

import jax
import jax.numpy as jnp
from jax.experimental import pallas as pl
from jax.experimental.pallas import tpu as pltpu


def _ceil128(n):
    return ((n + 127) // 128) * 128


def decoder_kernel(prev_m_ref, h0c0_ref, enc_ref, w_pm_ref, w_big_ref,
                   w_fc2_ref, b_ref, out_ref, h_sc, c_sc, *, S, H, M0, M1):
    """One decode step; grid axis 0 is time (sequential h/c carry in scratch)."""
    OD = M0 * M1

    # Static lane offsets inside the packed weight / bias buffers
    # (all region starts are multiples of 128 -> tile-aligned slices).
    wo_h = 0                                   # [w_hh gates (4H) | attn h (S)]
    wo_comb = _ceil128(4 * H + S)              # attn_combine h-block (H)
    wo_ih = wo_comb + _ceil128(H)              # LSTM w_ih gates (4H)
    wo_fc1 = wo_ih + _ceil128(4 * H)           # fc1 weight (128)
    bo_lstm = 0
    bo_fc1 = _ceil128(4 * H)
    bo_comb = bo_fc1 + 128
    bo_attn = bo_comb + _ceil128(H)
    bo_fc2 = bo_attn + _ceil128(S)

    t = pl.program_id(0)

    @pl.when(t == 0)
    def _():
        h_sc[...] = h0c0_ref[:, :H]
        c_sc[...] = h0c0_ref[:, H:]

    prev_m = prev_m_ref[0]                     # (B, I); eval-mode dropout == id
    h = h_sc[...]                              # (B, H)
    c = c_sc[...]                              # (B, H)

    # ---- merged prev_M matmul: [attn_combine prev block (H) | attn prev (S)]
    pm_out = jnp.dot(prev_m, w_pm_ref[...], preferred_element_type=jnp.float32)
    pm_comb = pm_out[:, :H]                    # lane 0 (reused slice aligned)
    pm_attn = pm_out[:, H:H + S]

    # ---- merged h matmul: [LSTM w_hh gates i|f|g|o (4H) | attn h block (S)]
    h_out = jnp.dot(h, w_big_ref[:, wo_h:wo_h + 4 * H + S],
                    preferred_element_type=jnp.float32)
    h_gates = h_out[:, :4 * H]
    h_attn = h_out[:, 4 * H:4 * H + S]

    # ---- attn_weights = softmax(Linear(cat(prev_M, h)), axis=-1) ------------
    logits = pm_attn + h_attn + b_ref[:, bo_attn:bo_attn + S]
    logits = logits - jnp.max(logits, axis=-1, keepdims=True)
    e = jnp.exp(logits)
    attn_w = e / jnp.sum(e, axis=-1, keepdims=True)            # (B, S)

    # ---- attn_applied = relu(einsum('lbs,sbh->lbh')) -------------------------
    # VPU broadcast-multiply + sublane reduce; no per-batch MXU pushes.
    applied = jnp.maximum(
        jnp.sum(attn_w[:, :, None] * enc_ref[...], axis=1), 0.0)   # (B, H)

    # ---- attn_combine + relu (LSTM input) ------------------------------------
    comb = (pm_comb
            + jnp.dot(applied, w_big_ref[:, wo_comb:wo_comb + H],
                      preferred_element_type=jnp.float32)
            + b_ref[:, bo_comb:bo_comb + H])
    x = jnp.maximum(comb, 0.0)                                     # (B, H)

    # ---- one-step LSTM cell, fused gates (PyTorch order i, f, g, o) ----------
    gates = (jnp.dot(x, w_big_ref[:, wo_ih:wo_ih + 4 * H],
                     preferred_element_type=jnp.float32)
             + h_gates + b_ref[:, bo_lstm:bo_lstm + 4 * H])        # (B, 4H)
    sg = jax.nn.sigmoid(gates)                                     # EUP, all lanes
    tg = jnp.tanh(gates)
    i_g = sg[:, 0:H]
    f_g = sg[:, H:2 * H]
    g_g = tg[:, 2 * H:3 * H]
    o_g = sg[:, 3 * H:4 * H]
    c_new = f_g * c + i_g * g_g
    h_new = o_g * jnp.tanh(c_new)
    h_sc[...] = h_new                                              # carry to t+1
    c_sc[...] = c_new

    # ---- fc1 -> relu -> fc2 ---------------------------------------------------
    z1 = jnp.maximum(
        jnp.dot(h_new, w_big_ref[:, wo_fc1:wo_fc1 + 128],
                preferred_element_type=jnp.float32)
        + b_ref[:, bo_fc1:bo_fc1 + 128], 0.0)                      # (B, 128)
    z2 = (jnp.dot(z1, w_fc2_ref[...], preferred_element_type=jnp.float32)
          + b_ref[:, bo_fc2:bo_fc2 + OD])                          # (B, OD)

    # ---- mt_norm == 1: softmax over M0 axis of M.view(B, M0, M1) -------------
    # Flat column k belongs to group k % M1; per-group denominator is computed
    # with M0-1 lane-slice adds + a lane concat (no indicator matmul).
    # Global row-max subtraction is group-invariant.
    z2 = z2 - jnp.max(z2, axis=-1, keepdims=True)
    e2 = jnp.exp(z2)
    gsum = e2[:, 0:M1]
    for i in range(1, M0):
        gsum = gsum + e2[:, i * M1:(i + 1) * M1]                   # (B, M1)
    denom = jnp.concatenate([gsum] * M0, axis=1)                   # (B, OD)
    m = e2 / denom

    # ---- single lane-dense 128-wide packed store ------------------------------
    B = h_new.shape[0]
    pad = 128 - (OD + S + 2 * H)
    out_ref[0] = jnp.concatenate(
        [m, attn_w, h_new, c_new, jnp.zeros((B, pad), jnp.float32)], axis=1)


def prepare_decoder_params(params, input_dim, hidden_dim, max_length, M_dim):
    """One-time (per-sequence) weight restructuring; hoisted out of the step."""
    I, H, S = input_dim, hidden_dim, max_length
    M0, M1 = M_dim
    OD = M0 * M1
    f32 = jnp.float32

    def padw(w, width):
        return jnp.pad(w, ((0, 0), (0, width - w.shape[1])))

    # prev_M-LHS merge, lane-aligned: [attn_combine prev block (H) | attn prev (S)]
    w_pm = jnp.concatenate([params['w_comb'][:I], params['w_attn'][:I]],
                           axis=1).astype(f32)                       # (I, H+S)

    # All h-first-dim weights packed into one lane-aligned buffer.
    w_hh = jnp.concatenate([params['w_hh'][k] for k in range(4)], axis=1)   # (H, 4H)
    w_h_blk = jnp.concatenate([w_hh, params['w_attn'][I:I + H]], axis=1)    # (H, 4H+S)
    w_ih = jnp.concatenate([params['w_ih'][k] for k in range(4)], axis=1)   # (H, 4H)
    w_comb_h = params['w_comb'][I:I + H]                                    # (H, H)
    w_big = jnp.concatenate([
        padw(w_h_blk, _ceil128(4 * H + S)),
        padw(w_comb_h, _ceil128(H)),
        padw(w_ih, _ceil128(4 * H)),
        padw(params['w_fc1'], 128),
    ], axis=1).astype(f32)

    # All biases packed into one lane-aligned buffer.
    b_lstm = jnp.concatenate([params['b_lstm'][k] for k in range(4)], axis=1)  # (1, 4H)
    b_all = jnp.concatenate([
        padw(b_lstm, _ceil128(4 * H)),
        padw(params['b_fc1'], 128),
        padw(params['b_comb'], _ceil128(H)),
        padw(params['b_attn'], _ceil128(S)),
        padw(params['b_fc2'], _ceil128(OD)),
    ], axis=1).astype(f32)

    return {'w_pm': w_pm, 'w_big': w_big,
            'w_fc2': params['w_fc2'].astype(f32), 'b_all': b_all}


def decoder_decode(prepped, prev_M_seq, enc_bsh, hidden, M_dim):
    """Run T decoder steps inside ONE pallas_call (hidden state carried in VMEM).

    prev_M_seq: (T, B, I) teacher-forced inputs; enc_bsh: (B, S, H).
    Returns (M_seq (T,B,M0,M1), attn_seq (T,B,S), new_hidden ((1,B,H),(1,B,H))).
    """
    T, B, I = prev_M_seq.shape
    _, S, H = enc_bsh.shape
    M0, M1 = M_dim
    OD = M0 * M1
    assert OD + S + 2 * H <= 128, "packed-output layout assumes one 128-lane slab"

    h0c0 = jnp.concatenate([hidden[0][0], hidden[1][0]], axis=1)    # (B, 2H)

    kernel = functools.partial(decoder_kernel, S=S, H=H, M0=M0, M1=M1)

    def resident(arr):
        n = arr.ndim
        # Whole array is the block; constant index_map -> DMA'd once, stays resident.
        return pl.BlockSpec(arr.shape, lambda t, n=n: (0,) * n)

    grid_spec = pltpu.PrefetchScalarGridSpec(
        num_scalar_prefetch=0,
        grid=(T,),
        in_specs=[
            pl.BlockSpec((1, B, I), lambda t: (t, 0, 0)),   # per-step prev_M
            resident(h0c0),
            resident(enc_bsh),
            resident(prepped['w_pm']),
            resident(prepped['w_big']),
            resident(prepped['w_fc2']),
            resident(prepped['b_all']),
        ],
        out_specs=pl.BlockSpec((1, B, 128), lambda t: (t, 0, 0)),
        scratch_shapes=[pltpu.VMEM((B, H), jnp.float32),    # h carry
                        pltpu.VMEM((B, H), jnp.float32)],   # c carry
    )

    packed = pl.pallas_call(
        kernel,
        out_shape=jax.ShapeDtypeStruct((T, B, 128), jnp.float32),
        grid_spec=grid_spec,
        compiler_params=pltpu.CompilerParams(
            dimension_semantics=("arbitrary",)),            # sequential h/c carry
    )(prev_M_seq, h0c0, enc_bsh, prepped['w_pm'], prepped['w_big'],
      prepped['w_fc2'], prepped['b_all'])

    M_seq = packed[:, :, :OD].reshape(T, B, M0, M1)
    attn_seq = packed[:, :, OD:OD + S]
    h_new = packed[-1, :, OD + S:OD + S + H]
    c_new = packed[-1, :, OD + S + H:OD + S + 2 * H]
    return M_seq, attn_seq, (h_new[None], c_new[None])


def decoder_forward(prepped, prev_M, enc_bsh, hidden, M_dim):
    """Single step, mirrors Decoder.forward (mt_norm=1, eval-mode dropout).

    Returns ((M, attn_weights, zeros(B,1)), new_hidden).
    """
    B = prev_M.shape[1]
    M_seq, attn_seq, new_hidden = decoder_decode(prepped, prev_M, enc_bsh,
                                                 hidden, M_dim)
    return (M_seq[0], attn_seq, jnp.zeros((B, 1), jnp.float32)), new_hidden


def decoder_forward_ref(params, prev_M, encoder_outputs, hidden, M_dim):
    """Pure-JAX reference reproducing the PyTorch forward (original params)."""
    x = prev_M[0]
    h, c = hidden[0][0], hidden[1][0]
    logits = jnp.concatenate([x, h], axis=1) @ params['w_attn'] + params['b_attn'][0]
    attn_w = jax.nn.softmax(logits, axis=-1)
    applied = jax.nn.relu(jnp.einsum('bs,sbh->bh', attn_w, encoder_outputs))
    comb = (jnp.concatenate([x, applied], axis=1) @ params['w_comb']
            + params['b_comb'][0])
    xin = jax.nn.relu(comb)
    g = [xin @ params['w_ih'][k] + h @ params['w_hh'][k] + params['b_lstm'][k][0]
         for k in range(4)]
    i_g, f_g = jax.nn.sigmoid(g[0]), jax.nn.sigmoid(g[1])
    g_g, o_g = jnp.tanh(g[2]), jax.nn.sigmoid(g[3])
    c_new = f_g * c + i_g * g_g
    h_new = o_g * jnp.tanh(c_new)
    z1 = jax.nn.relu(h_new @ params['w_fc1'] + params['b_fc1'][0])
    z2 = z1 @ params['w_fc2'] + params['b_fc2'][0]
    B = x.shape[0]
    M = jax.nn.softmax(z2.reshape(B, M_dim[0], M_dim[1]), axis=1)
    return M, attn_w[None], h_new, c_new


if __name__ == "__main__":
    # Small shapes consistent with the module.
    max_length, hidden_dim = 8, 32
    M_dim = (4, 4)
    output_dim = M_dim[0] * M_dim[1]       # 16
    input_dim = output_dim                 # 16
    batch = 2

    key = jax.random.PRNGKey(0)
    ks = jax.random.split(key, 16)

    def u(k, shape):
        return jax.random.uniform(k, shape, jnp.float32, -0.1, 0.1)

    params = {
        'w_attn': u(ks[0], (input_dim + hidden_dim, max_length)),
        'b_attn': u(ks[1], (1, max_length)),
        'w_comb': u(ks[2], (input_dim + hidden_dim, hidden_dim)),
        'b_comb': u(ks[3], (1, hidden_dim)),
        'w_ih':   u(ks[4], (4, hidden_dim, hidden_dim)),   # gate order i,f,g,o
        'w_hh':   u(ks[5], (4, hidden_dim, hidden_dim)),
        'b_lstm': u(ks[6], (4, 1, hidden_dim)),            # b_ih + b_hh combined
        'w_fc1':  u(ks[7], (hidden_dim, 128)),
        'b_fc1':  u(ks[8], (1, 128)),
        'w_fc2':  u(ks[9], (128, output_dim)),
        'b_fc2':  u(ks[10], (1, output_dim)),
    }

    prev_M = jax.random.normal(ks[11], (1, batch, input_dim), jnp.float32)
    encoder_outputs = jax.random.normal(ks[12], (max_length, batch, hidden_dim),
                                        jnp.float32)
    hidden = (jax.random.normal(ks[13], (1, batch, hidden_dim), jnp.float32),
              jax.random.normal(ks[14], (1, batch, hidden_dim), jnp.float32))

    # One-time (per-sequence) prep: weight packing + encoder transpose.
    prepped = prepare_decoder_params(params, input_dim, hidden_dim,
                                     max_length, M_dim)
    enc_bsh = jnp.transpose(encoder_outputs, (1, 0, 2))          # (B, S, H)

    # ---- single step (matches Decoder.forward) --------------------------------
    (M, attn_weights, zeros_out), new_hidden = decoder_forward(
        prepped, prev_M, enc_bsh, hidden, M_dim)
    jax.block_until_ready((M, attn_weights, zeros_out, new_hidden))

    M_r, aw_r, h_r, c_r = decoder_forward_ref(params, prev_M, encoder_outputs,
                                              hidden, M_dim)
    assert M.shape == (batch, M_dim[0], M_dim[1])
    assert attn_weights.shape == (1, batch, max_length)
    assert zeros_out.shape == (batch, 1)
    assert jnp.allclose(M, M_r, atol=1e-5)
    assert jnp.allclose(attn_weights, aw_r, atol=1e-5)
    assert jnp.allclose(new_hidden[0][0], h_r, atol=1e-5)
    assert jnp.allclose(new_hidden[1][0], c_r, atol=1e-5)

    # ---- multi-step decode in ONE kernel call (loop-hoist path) ---------------
    T = 4
    prev_M_seq = jax.random.normal(ks[15], (T, batch, input_dim), jnp.float32)
    M_seq, attn_seq, (h_T, c_T) = decoder_decode(prepped, prev_M_seq, enc_bsh,
                                                 hidden, M_dim)
    jax.block_until_ready((M_seq, attn_seq, h_T, c_T))

    h_rr, c_rr = hidden[0][0], hidden[1][0]
    for t in range(T):
        M_rt, aw_rt, h_rr, c_rr = decoder_forward_ref(
            params, prev_M_seq[t:t + 1], encoder_outputs,
            (h_rr[None], c_rr[None]), M_dim)
        assert jnp.allclose(M_seq[t], M_rt, atol=1e-4)
        assert jnp.allclose(attn_seq[t], aw_rt[0], atol=1e-4)
    assert jnp.allclose(h_T[0], h_rr, atol=1e-4)
    assert jnp.allclose(c_T[0], c_rr, atol=1e-4)

    print("KERNEL_OK")
</pallas_src>

<mosaic_0001>
module attributes {stable_mosaic.version = 11 : i64} {
  func.func @decoder_kernel(%arg0: i32, %arg1: memref<1x2x16xf32, #tpu.memory_space<vmem>>, %arg2: memref<2x64xf32, #tpu.memory_space<vmem>>, %arg3: memref<2x8x32xf32, #tpu.memory_space<vmem>>, %arg4: memref<16x40xf32, #tpu.memory_space<vmem>>, %arg5: memref<32x640xf32, #tpu.memory_space<vmem>>, %arg6: memref<128x16xf32, #tpu.memory_space<vmem>>, %arg7: memref<1x640xf32, #tpu.memory_space<vmem>>, %arg8: memref<1x2x128xf32, #tpu.memory_space<vmem>>, %arg9: memref<2x32xf32, #tpu.memory_space<vmem>>, %arg10: memref<2x32xf32, #tpu.memory_space<vmem>>) attributes {dimension_semantics = [#tpu.dimension_semantics<arbitrary>], iteration_bounds = array<i64: 1>, scalar_prefetch = 0 : i64, scratch_operands = 2 : i64, tpu.core_type = #tpu.core_type<tc>, window_params = [{transform_indices = @transform_0, window_bounds = array<i64: 1, 2, 16>}, {pipeline_mode = #tpu.pipeline_mode<synchronous>, transform_indices = @transform_1, window_bounds = array<i64: 2, 64>}, {pipeline_mode = #tpu.pipeline_mode<synchronous>, transform_indices = @transform_2, window_bounds = array<i64: 2, 8, 32>}, {pipeline_mode = #tpu.pipeline_mode<synchronous>, transform_indices = @transform_3, window_bounds = array<i64: 16, 40>}, {pipeline_mode = #tpu.pipeline_mode<synchronous>, transform_indices = @transform_4, window_bounds = array<i64: 32, 640>}, {pipeline_mode = #tpu.pipeline_mode<synchronous>, transform_indices = @transform_5, window_bounds = array<i64: 128, 16>}, {pipeline_mode = #tpu.pipeline_mode<synchronous>, transform_indices = @transform_6, window_bounds = array<i64: 1, 640>}, {transform_indices = @transform_7, window_bounds = array<i64: 1, 2, 128>}]} {
    %c0_i32 = arith.constant 0 : i32
    %0 = arith.cmpi eq, %arg0, %c0_i32 : i32
    %1 = arith.extui %0 : i1 to i32
    %c0_i32_0 = arith.constant 0 : i32
    %2 = arith.cmpi ne, %1, %c0_i32_0 : i32
    scf.if %2 {
      %c0_49 = arith.constant 0 : index
      %c0_50 = arith.constant 0 : index
      %97 = vector.load %arg2[%c0_49, %c0_50] : memref<2x64xf32, #tpu.memory_space<vmem>>, vector<2x32xf32>
      %c0_51 = arith.constant 0 : index
      %c0_52 = arith.constant 0 : index
      %98 = vector.load %arg9[%c0_51, %c0_52] : memref<2x32xf32, #tpu.memory_space<vmem>>, vector<2x32xf32>
      tpu.vector_store %arg9[%c0_51, %c0_52], %97 {strides = array<i32>} : memref<2x32xf32, #tpu.memory_space<vmem>>, vector<2x32xf32>,
      %c0_53 = arith.constant 0 : index
      %c32 = arith.constant 32 : index
      %99 = vector.load %arg2[%c0_53, %c32] : memref<2x64xf32, #tpu.memory_space<vmem>>, vector<2x32xf32>
      %c0_54 = arith.constant 0 : index
      %c0_55 = arith.constant 0 : index
      %100 = vector.load %arg10[%c0_54, %c0_55] : memref<2x32xf32, #tpu.memory_space<vmem>>, vector<2x32xf32>
      tpu.vector_store %arg10[%c0_54, %c0_55], %99 {strides = array<i32>} : memref<2x32xf32, #tpu.memory_space<vmem>>, vector<2x32xf32>,
    } else {
    }
    %c0 = arith.constant 0 : index
    %c0_1 = arith.constant 0 : index
    %c0_2 = arith.constant 0 : index
    %3 = vector.load %arg1[%c0, %c0_1, %c0_2] : memref<1x2x16xf32, #tpu.memory_space<vmem>>, vector<1x2x16xf32>
    %4 = vector.shape_cast %3 : vector<1x2x16xf32> to vector<2x16xf32>
    %c0_3 = arith.constant 0 : index
    %c0_4 = arith.constant 0 : index
    %5 = vector.load %arg9[%c0_3, %c0_4] : memref<2x32xf32, #tpu.memory_space<vmem>>, vector<2x32xf32>
    %c0_5 = arith.constant 0 : index
    %c0_6 = arith.constant 0 : index
    %6 = vector.load %arg10[%c0_5, %c0_6] : memref<2x32xf32, #tpu.memory_space<vmem>>, vector<2x32xf32>
    %c0_7 = arith.constant 0 : index
    %c0_8 = arith.constant 0 : index
    %7 = vector.load %arg4[%c0_7, %c0_8] : memref<16x40xf32, #tpu.memory_space<vmem>>, vector<16x40xf32>
    %cst = arith.constant dense<0.000000e+00> : vector<2x40xf32>
    %8 = tpu.matmul %4, %7, %cst {dimension_numbers = #tpu.dot_dimension_numbers<[1], [0], [0], [1], [0, 0, 1, 1], [], []>} : vector<2x16xf32>, vector<16x40xf32>, vector<2x40xf32> -> vector<2x40xf32>
    %9 = vector.extract_strided_slice %8 {offsets = [0, 0], sizes = [2, 32], strides = [1, 1]} : vector<2x40xf32> to vector<2x32xf32>
    %10 = vector.extract_strided_slice %8 {offsets = [0, 32], sizes = [2, 8], strides = [1, 1]} : vector<2x40xf32> to vector<2x8xf32>
    %c0_9 = arith.constant 0 : index
    %c0_10 = arith.constant 0 : index
    %11 = vector.load %arg5[%c0_9, %c0_10] : memref<32x640xf32, #tpu.memory_space<vmem>>, vector<32x136xf32>
    %cst_11 = arith.constant dense<0.000000e+00> : vector<2x136xf32>
    %12 = tpu.matmul %5, %11, %cst_11 {dimension_numbers = #tpu.dot_dimension_numbers<[1], [0], [0], [1], [0, 0, 1, 1], [], []>} : vector<2x32xf32>, vector<32x136xf32>, vector<2x136xf32> -> vector<2x136xf32>
    %13 = vector.extract_strided_slice %12 {offsets = [0, 0], sizes = [2, 128], strides = [1, 1]} : vector<2x136xf32> to vector<2x128xf32>
    %14 = vector.extract_strided_slice %12 {offsets = [0, 128], sizes = [2, 8], strides = [1, 1]} : vector<2x136xf32> to vector<2x8xf32>
    %15 = arith.addf %10, %14 : vector<2x8xf32>
    %c0_12 = arith.constant 0 : index
    %c384 = arith.constant 384 : index
    %16 = vector.load %arg7[%c0_12, %c384] : memref<1x640xf32, #tpu.memory_space<vmem>>, vector<1x8xf32>
    %17 = vector.broadcast %16 : vector<1x8xf32> to vector<2x8xf32>
    %18 = arith.addf %15, %17 : vector<2x8xf32>
    %cst_13 = arith.constant dense<0xFF800000> : vector<2xf32>
    %19 = vector.multi_reduction <maximumf>, %18, %cst_13 [1] : vector<2x8xf32> to vector<2xf32>
    %20 = vector.shape_cast %19 : vector<2xf32> to vector<2x1xf32>
    %21 = vector.broadcast %20 : vector<2x1xf32> to vector<2x8xf32>
    %22 = arith.subf %18, %21 : vector<2x8xf32>
    %23 = math.exp %22 : vector<2x8xf32>
    %cst_14 = arith.constant dense<0.000000e+00> : vector<2xf32>
    %24 = vector.multi_reduction <add>, %23, %cst_14 [1] : vector<2x8xf32> to vector<2xf32>
    %25 = vector.shape_cast %24 : vector<2xf32> to vector<2x1xf32>
    %26 = vector.broadcast %25 : vector<2x1xf32> to vector<2x8xf32>
    %27 = arith.divf %23, %26 : vector<2x8xf32>
    %28 = vector.shape_cast %27 : vector<2x8xf32> to vector<2x8x1xf32>
    %c0_15 = arith.constant 0 : index
    %c0_16 = arith.constant 0 : index
    %c0_17 = arith.constant 0 : index
    %29 = vector.load %arg3[%c0_15, %c0_16, %c0_17] : memref<2x8x32xf32, #tpu.memory_space<vmem>>, vector<2x8x32xf32>
    %30 = vector.broadcast %28 : vector<2x8x1xf32> to vector<2x8x32xf32>
    %31 = arith.mulf %30, %29 : vector<2x8x32xf32>
    %cst_18 = arith.constant dense<0.000000e+00> : vector<2x32xf32>
    %32 = vector.multi_reduction <add>, %31, %cst_18 [1] : vector<2x8x32xf32> to vector<2x32xf32>
    %cst_19 = arith.constant 0.000000e+00 : f32
    %33 = vector.broadcast %cst_19 : f32 to vector<2x32xf32>
    %34 = arith.maximumf %32, %33 : vector<2x32xf32>
    %c0_20 = arith.constant 0 : index
    %c256 = arith.constant 256 : index
    %35 = vector.load %arg5[%c0_20, %c256] : memref<32x640xf32, #tpu.memory_space<vmem>>, vector<32x32xf32>
    %cst_21 = arith.constant dense<0.000000e+00> : vector<2x32xf32>
    %36 = tpu.matmul %34, %35, %cst_21 {dimension_numbers = #tpu.dot_dimension_numbers<[1], [0], [0], [1], [0, 0, 1, 1], [], []>} : vector<2x32xf32>, vector<32x32xf32>, vector<2x32xf32> -> vector<2x32xf32>
    %37 = arith.addf %9, %36 : vector<2x32xf32>
    %c0_22 = arith.constant 0 : index
    %c256_23 = arith.constant 256 : index
    %38 = vector.load %arg7[%c0_22, %c256_23] : memref<1x640xf32, #tpu.memory_space<vmem>>, vector<1x32xf32>
    %39 = vector.broadcast %38 : vector<1x32xf32> to vector<2x32xf32>
    %40 = arith.addf %37, %39 : vector<2x32xf32>
    %cst_24 = arith.constant 0.000000e+00 : f32
    %41 = vector.broadcast %cst_24 : f32 to vector<2x32xf32>
    %42 = arith.maximumf %40, %41 : vector<2x32xf32>
    %c0_25 = arith.constant 0 : index
    %c384_26 = arith.constant 384 : index
    %43 = vector.load %arg5[%c0_25, %c384_26] : memref<32x640xf32, #tpu.memory_space<vmem>>, vector<32x128xf32>
    %cst_27 = arith.constant dense<0.000000e+00> : vector<2x128xf32>
    %44 = tpu.matmul %42, %43, %cst_27 {dimension_numbers = #tpu.dot_dimension_numbers<[1], [0], [0], [1], [0, 0, 1, 1], [], []>} : vector<2x32xf32>, vector<32x128xf32>, vector<2x128xf32> -> vector<2x128xf32>
    %45 = arith.addf %44, %13 : vector<2x128xf32>
    %c0_28 = arith.constant 0 : index
    %c0_29 = arith.constant 0 : index
    %46 = vector.load %arg7[%c0_28, %c0_29] : memref<1x640xf32, #tpu.memory_space<vmem>>, vector<1x128xf32>
    %47 = vector.broadcast %46 : vector<1x128xf32> to vector<2x128xf32>
    %48 = arith.addf %45, %47 : vector<2x128xf32>
    %49 = arith.negf %48 : vector<2x128xf32>
    %50 = math.exp %49 : vector<2x128xf32>
    %cst_30 = arith.constant 1.000000e+00 : f32
    %51 = vector.broadcast %cst_30 : f32 to vector<2x128xf32>
    %52 = arith.addf %51, %50 : vector<2x128xf32>
    %53 = arith.divf %51, %52 : vector<2x128xf32>
    %54 = math.tanh %48 : vector<2x128xf32>
    %55 = vector.extract_strided_slice %53 {offsets = [0, 0], sizes = [2, 32], strides = [1, 1]} : vector<2x128xf32> to vector<2x32xf32>
    %56 = vector.extract_strided_slice %53 {offsets = [0, 32], sizes = [2, 32], strides = [1, 1]} : vector<2x128xf32> to vector<2x32xf32>
    %57 = vector.extract_strided_slice %54 {offsets = [0, 64], sizes = [2, 32], strides = [1, 1]} : vector<2x128xf32> to vector<2x32xf32>
    %58 = vector.extract_strided_slice %53 {offsets = [0, 96], sizes = [2, 32], strides = [1, 1]} : vector<2x128xf32> to vector<2x32xf32>
    %59 = arith.mulf %56, %6 : vector<2x32xf32>
    %60 = arith.mulf %55, %57 : vector<2x32xf32>
    %61 = arith.addf %59, %60 : vector<2x32xf32>
    %62 = math.tanh %61 : vector<2x32xf32>
    %63 = arith.mulf %58, %62 : vector<2x32xf32>
    %c0_31 = arith.constant 0 : index
    %c0_32 = arith.constant 0 : index
    %64 = vector.load %arg9[%c0_31, %c0_32] : memref<2x32xf32, #tpu.memory_space<vmem>>, vector<2x32xf32>
    tpu.vector_store %arg9[%c0_31, %c0_32], %63 {strides = array<i32>} : memref<2x32xf32, #tpu.memory_space<vmem>>, vector<2x32xf32>,
    %c0_33 = arith.constant 0 : index
    %c0_34 = arith.constant 0 : index
    %65 = vector.load %arg10[%c0_33, %c0_34] : memref<2x32xf32, #tpu.memory_space<vmem>>, vector<2x32xf32>
    tpu.vector_store %arg10[%c0_33, %c0_34], %61 {strides = array<i32>} : memref<2x32xf32, #tpu.memory_space<vmem>>, vector<2x32xf32>,
    %c0_35 = arith.constant 0 : index
    %c512 = arith.constant 512 : index
    %66 = vector.load %arg5[%c0_35, %c512] : memref<32x640xf32, #tpu.memory_space<vmem>>, vector<32x128xf32>
    %cst_36 = arith.constant dense<0.000000e+00> : vector<2x128xf32>
    %67 = tpu.matmul %63, %66, %cst_36 {dimension_numbers = #tpu.dot_dimension_numbers<[1], [0], [0], [1], [0, 0, 1, 1], [], []>} : vector<2x32xf32>, vector<32x128xf32>, vector<2x128xf32> -> vector<2x128xf32>
    %c0_37 = arith.constant 0 : index
    %c128 = arith.constant 128 : index
    %68 = vector.load %arg7[%c0_37, %c128] : memref<1x640xf32, #tpu.memory_space<vmem>>, vector<1x128xf32>
    %69 = vector.broadcast %68 : vector<1x128xf32> to vector<2x128xf32>
    %70 = arith.addf %67, %69 : vector<2x128xf32>
    %cst_38 = arith.constant 0.000000e+00 : f32
    %71 = vector.broadcast %cst_38 : f32 to vector<2x128xf32>
    %72 = arith.maximumf %70, %71 : vector<2x128xf32>
    %c0_39 = arith.constant 0 : index
    %c0_40 = arith.constant 0 : index
    %73 = vector.load %arg6[%c0_39, %c0_40] : memref<128x16xf32, #tpu.memory_space<vmem>>, vector<128x16xf32>
    %cst_41 = arith.constant dense<0.000000e+00> : vector<2x16xf32>
    %74 = tpu.matmul %72, %73, %cst_41 {dimension_numbers = #tpu.dot_dimension_numbers<[1], [0], [0], [1], [0, 0, 1, 1], [], []>} : vector<2x128xf32>, vector<128x16xf32>, vector<2x16xf32> -> vector<2x16xf32>
    %c0_42 = arith.constant 0 : index
    %c512_43 = arith.constant 512 : index
    %75 = vector.load %arg7[%c0_42, %c512_43] : memref<1x640xf32, #tpu.memory_space<vmem>>, vector<1x16xf32>
    %76 = vector.broadcast %75 : vector<1x16xf32> to vector<2x16xf32>
    %77 = arith.addf %74, %76 : vector<2x16xf32>
    %cst_44 = arith.constant dense<0xFF800000> : vector<2xf32>
    %78 = vector.multi_reduction <maximumf>, %77, %cst_44 [1] : vector<2x16xf32> to vector<2xf32>
    %79 = vector.shape_cast %78 : vector<2xf32> to vector<2x1xf32>
    %80 = vector.broadcast %79 : vector<2x1xf32> to vector<2x16xf32>
    %81 = arith.subf %77, %80 : vector<2x16xf32>
    %82 = math.exp %81 : vector<2x16xf32>
    %83 = vector.extract_strided_slice %82 {offsets = [0, 0], sizes = [2, 4], strides = [1, 1]} : vector<2x16xf32> to vector<2x4xf32>
    %84 = vector.extract_strided_slice %82 {offsets = [0, 4], sizes = [2, 4], strides = [1, 1]} : vector<2x16xf32> to vector<2x4xf32>
    %85 = arith.addf %83, %84 : vector<2x4xf32>
    %86 = vector.extract_strided_slice %82 {offsets = [0, 8], sizes = [2, 4], strides = [1, 1]} : vector<2x16xf32> to vector<2x4xf32>
    %87 = arith.addf %85, %86 : vector<2x4xf32>
    %88 = vector.extract_strided_slice %82 {offsets = [0, 12], sizes = [2, 4], strides = [1, 1]} : vector<2x16xf32> to vector<2x4xf32>
    %89 = arith.addf %87, %88 : vector<2x4xf32>
    %90 = tpu.concatenate %89, %89, %89, %89 in 1 : vector<2x4xf32>, vector<2x4xf32>, vector<2x4xf32>, vector<2x4xf32> -> vector<2x16xf32>
    %91 = arith.divf %82, %90 : vector<2x16xf32>
    %cst_45 = arith.constant 0.000000e+00 : f32
    %92 = vector.broadcast %cst_45 : f32 to vector<2x40xf32>
    %93 = tpu.concatenate %91, %27, %63, %61, %92 in 1 : vector<2x16xf32>, vector<2x8xf32>, vector<2x32xf32>, vector<2x32xf32>, vector<2x40xf32> -> vector<2x128xf32>
    %c0_46 = arith.constant 0 : index
    %c0_47 = arith.constant 0 : index
    %c0_48 = arith.constant 0 : index
    %94 = vector.load %arg8[%c0_46, %c0_47, %c0_48] : memref<1x2x128xf32, #tpu.memory_space<vmem>>, vector<1x2x128xf32>
    %95 = vector.shape_cast %94 : vector<1x2x128xf32> to vector<2x128xf32>
    %96 = vector.shape_cast %93 : vector<2x128xf32> to vector<1x2x128xf32>
    tpu.vector_store %arg8[%c0_46, %c0_47, %c0_48], %96 {strides = array<i32>} : memref<1x2x128xf32, #tpu.memory_space<vmem>>, vector<1x2x128xf32>,
    return
  }
  func.func @transform_0(%arg0: i32) -> (i32, i32, i32) {
    %c0_i32 = arith.constant 0 : i32
    %c0_i32_0 = arith.constant 0 : i32
    %c0_i32_1 = arith.constant 0 : i32
    return %arg0, %c0_i32, %c0_i32_0 : i32, i32, i32
  }
  func.func @transform_1(%arg0: i32) -> (i32, i32) {
    %c0_i32 = arith.constant 0 : i32
    %c0_i32_0 = arith.constant 0 : i32
    %c0_i32_1 = arith.constant 0 : i32
    return %c0_i32, %c0_i32_0 : i32, i32
  }
  func.func @transform_2(%arg0: i32) -> (i32, i32, i32) {
    %c0_i32 = arith.constant 0 : i32
    %c0_i32_0 = arith.constant 0 : i32
    %c0_i32_1 = arith.constant 0 : i32
    %c0_i32_2 = arith.constant 0 : i32
    return %c0_i32, %c0_i32_0, %c0_i32_1 : i32, i32, i32
  }
  func.func @transform_3(%arg0: i32) -> (i32, i32) {
    %c0_i32 = arith.constant 0 : i32
    %c0_i32_0 = arith.constant 0 : i32
    %c0_i32_1 = arith.constant 0 : i32
    return %c0_i32, %c0_i32_0 : i32, i32
  }
  func.func @transform_4(%arg0: i32) -> (i32, i32) {
    %c0_i32 = arith.constant 0 : i32
    %c0_i32_0 = arith.constant 0 : i32
    %c0_i32_1 = arith.constant 0 : i32
    return %c0_i32, %c0_i32_0 : i32, i32
  }
  func.func @transform_5(%arg0: i32) -> (i32, i32) {
    %c0_i32 = arith.constant 0 : i32
    %c0_i32_0 = arith.constant 0 : i32
    %c0_i32_1 = arith.constant 0 : i32
    return %c0_i32, %c0_i32_0 : i32, i32
  }
  func.func @transform_6(%arg0: i32) -> (i32, i32) {
    %c0_i32 = arith.constant 0 : i32
    %c0_i32_0 = arith.constant 0 : i32
    %c0_i32_1 = arith.constant 0 : i32
    return %c0_i32, %c0_i32_0 : i32, i32
  }
  func.func @transform_7(%arg0: i32) -> (i32, i32, i32) {
    %c0_i32 = arith.constant 0 : i32
    %c0_i32_0 = arith.constant 0 : i32
    %c0_i32_1 = arith.constant 0 : i32
    return %arg0, %c0_i32, %c0_i32_0 : i32, i32, i32
  }
}

</mosaic_0001>

<bundles_post_ra>
// kernel: tpu_custom_call.1
= control target key start
LH: loop header
LB: loop body
LE: loop exit
PB: predicated region body
PF: predicated region fallthrough
CT: control target
= control target key end

     0   :  { %12 = vsyncpa [#allocation5], 0  ;;  %s1171_s0 = inlined_call_operand.vmem [shape: f32[1,2,16], index: 0, kind: input, shape index: {}]   ;;  %s1172_s1 = inlined_call_operand.vmem [shape: f32[2,64], index: 1, kind: input, shape index: {}]   ;;  %s1173_s2 = inlined_call_operand.vmem [shape: f32[2,8,32], index: 2, kind: input, shape index: {}]   ;;  %s1174_s3 = inlined_call_operand.vmem [shape: f32[16,40], index: 3, kind: input, shape index: {}]   ;;  %s1175_s4 = inlined_call_operand.hbm [shape: f32[32,640], index: 4, kind: input, shape index: {}]   ;;  %s1176_s5 = inlined_call_operand.vmem [shape: f32[128,16], index: 5, kind: input, shape index: {}]   ;;  %s1177_s6 = inlined_call_operand.vmem [shape: f32[1,640], index: 6, kind: input, shape index: {}]   ;;  %s1178_s7 = inlined_call_operand.hbm [shape: f32[1,2,128], index: 7, kind: output, shape index: {}]  }
   0x1   :  { %13 = vsyncpa [#allocation6], 0  ;;  %s945_s24 = smov [#allocation4]  }
   0x2   :  { %s27_s25 = sshll.u32 %s945_s24, 4  ;;  %s28_s25 = int_to_ptr.vmem [resolvable:$true] %s27_s25 }
   0x3   :  { %s909_s26 = scalar_lea.vmem %s28_s25, 2560  ;;  %p914_p1 = scmp.lt.s32.totalorder %s28_s25, %s28_s25 }
   0x4   :  { %p910_p0 = scmp.ne.s32.totalorder %s28_s25, %s909_s26  ;;  %p915_p2 = scmp.lt.s32.totalorder %s909_s26, %s909_s26 }
   0x6   :  { %p916_p3 = por %p915_p2, %p914_p1 }
   0x8   :  { %p917_p4 = pnand %p916_p3, %p910_p0 }
   0xa   :  { %920 = shalt.err (!%p917_p4)
}
   0xb   :  { %s946_s27 = smov 640   ;;  %s947_s28 = smov 40  }
   0xc   :  { %33 = dma.hbm_to_vmem [thread:$0]  %s1175_s4, 2560, %s28_s25, [#allocation5], %s946_s27, %s946_s27, %s947_s28  }
   0xd   :  { %941 = dma.done.wait [#allocation5], 2560  }
   0xe   :  { %942 = vsyncadd [#allocation5], 4294964736  ;;  %v948_v0 = vmov 0.0   ;;  %vm949_vm0 = vmmov 0   ;;  %v58_v1 = vld [vmem:[%s1174_s3 + $0x8] sm:$0xff]  ;;  %v57_v2 = vld [vmem:[%s1174_s3] sm:$0xff]  ;;  %v248_v31 = vlaneseq }
   0xf   :  { %792 = vmatprep.subr.mxu0 %v948_v0  ;;  %796 = vmatprep.mubr.msk.f32.mxu0 %vm949_vm0, %v948_v0  ;;  %v54_v3 = vld [vmem:[%s1171_s0] sm:$0x3]  ;;  %vm59_vm1 = vcmask 130048   ;;  %v140_v4 = vld [vmem:[#allocation4 + $0x80] sm:$0xff]  ;;  %vm46_vm2 = vcmask 254976   ;;  %v137_v8 = vld [vmem:[#allocation4 + $0x50] sm:$0xff] }
  0x10   :  { %832 = vmatprep.subr.mxu1 %v948_v0  ;;  %864 = vmatprep.mubr.msk.f32.mxu1 %vm949_vm0, %v948_v0  ;;  %v139_v5 = vld [vmem:[#allocation4 + $0x78] sm:$0xff]  ;;  %v136_v9 = vld [vmem:[#allocation4 + $0x30] sm:$0xff]  ;;  %v135_v10 = vld [vmem:[#allocation4 + $0x28] sm:$0xff]  ;;  %vm141_vm3 = vcmask 261120   ;;  %s950_s0 = smov 32   ;;  %vm231_vm4 = vcmask 320768  }
  0x11   :  { %793 = vmatpush3.msra.mxu0 %v58_v1  ;;  %v138_v6 = vld [vmem:[#allocation4 + $0x58] sm:$0xff]  ;;  %v134_v11 = vld [vmem:[#allocation4 + $0x8] sm:$0xff]  ;;  %v133_v12 = vld [vmem:[#allocation4] sm:$0xff]  ;;  %s951_s16 = smov 96   ;;  %vm242_vm5 = vcmask 58368   ;;  %v249_v32 = vshrl.u32 %v248_v31, 7 }
  0x12   :  { %794 = vmatprep.subr.mxu0 %v948_v0  ;;  %v45_v7 = vld [vmem:[%s1172_s1] sm:$0x3]  ;;  %v748_v18 = vld [vmem:[%s1177_s6 + $0x3] ss:$0 sm:$0xff]  ;;  %v287_v38 = vld [vmem:[#allocation4 + $0x88] sm:$0xff]  ;;  %vm290_vm6 = vcmask 1041409  }
  0x13   :  { %795 = vmatpush3.msra.mxu0 %v57_v2  ;;  %47 = vst.msk [vmem:[#allocation2] sm:$0x3] %vm46_vm2, %v45_v7  ;;  %v250_v33 = vsub.s32 0, %v249_v32  ;;  %v258_v37 = vsub.s32 1, %v249_v32  ;;  %v286_v40 = vld [vmem:[#allocation4 + $0x60] sm:$0xff]  ;;  %v285_v41 = vld [vmem:[#allocation4 + $0x38] sm:$0xff] }
  0x14   :  { %797 = vmatmul.mubr.msk.f32.vlgmr.msra.gmra.mxu0 %vm59_vm1, %v54_v3  ;;  %169 = vmatprep.subr.mxu0 %v140_v4  ;;  %v284_v42 = vld [vmem:[#allocation4 + $0x10] sm:$0xff]  ;;  %v264_v43 = vld [vmem:[%s1173_s2] sm:$0xff]  ;;  %v265_v46 = vld [vmem:[%s1173_s2 + $0x8] sm:$0xff]  ;;  %s952_s25 = smov 64   ;;  %vm675_vm7 = vcmask 123904   ;;  %s954_s11 = smov 124  }
  0x15   :  { %170 = vmatpush1.msra.mxu0 %v139_v5  ;;  %209 = vmatprep.mubr.f32.mxu0 %v948_v0  ;;  %v377_v3 = vld [vmem:[#allocation4 + $0x90] sm:$0xff]  ;;  %v376_v4 = vld [vmem:[#allocation4 + $0x68] sm:$0xff]  ;;  %v375_v5 = vld [vmem:[#allocation4 + $0x40] sm:$0xff]  ;;  %s955_s12 = smov 120   ;;  %s956_s13 = smov 116   ;;  %vm705_vm8 = vcmask 31744  }
  0x16   :  { %171 = vmatprep.subr.mxu0 %v138_v6  ;;  %v374_v6 = vld [vmem:[#allocation4 + $0x18] sm:$0xff]  ;;  %s958_s14 = smov 8   ;;  %s959_s3 = smov 12   ;;  %vm707_vm9 = vcmask 64512   ;;  %vm709_vm10 = vcmask 97280   ;;  %vm724_vm11 = vcmask 195584  }
  0x17   :  { %172 = vmatpush1.msra.mxu0 %v137_v8  ;;  %v48_v7 = vld [vmem:[%s1172_s1] sm:$0x3]  ;;  %s960_s15 = smov 112   ;;  %s961_s17 = smov 24   ;;  %vm726_vm12 = vcmask 457728   ;;  %vm728_vm13 = vcmask 719872  }
  0x18   :  { %173 = vmatprep.subr.mxu0 %v136_v9  ;;  %v750_v9 = vld [vmem:[%s1177_s6 + $0x2] ss:$0 sm:$0xff] }
  0x19   :  { %174 = vmatpush1.msra.mxu0 %v135_v10  ;;  %v501_v32 = vld [vmem:[#allocation4 + $0x98] sm:$0xff] }
  0x1a   :  { %175 = vmatprep.subr.mxu0 %v134_v11  ;;  %v55_v13 = vld [vmem:[#allocation2] sm:$0x3] }
  0x1b   :  { %176 = vmatpush1.msra.mxu0 %v133_v12 }
  0x1c   :  { %747 = vmatmul.mubr.msk.f32.vlgmr.msra.gmra.mxu0 %vm141_vm3, %v55_v13  ;;  %799 = vmatprep.subr.mxu0 %v948_v0 }
  0x1d   :  { %807 = vmatprep.mubr.msk.f32.mxu0 %vm949_vm0, %v948_v0  ;;  %800 = vmatpush3.msra.mxu0 %v287_v38  ;;  %v597_v38 = vld [vmem:[%s1176_s5 + $0x78] sm:$0xff] }
  0x1e   :  { %801 = vmatprep.subr.mxu0 %v948_v0  ;;  %833 = vmatpush3.msra.mxu1 %v597_v38 }
  0x1f   :  { %802 = vmatpush3.msra.mxu0 %v286_v40  ;;  %834 = vmatprep.subr.mxu1 %v948_v0  ;;  %v595_v40 = vld [vmem:[%s1176_s5 + $0x68] sm:$0xff] }
  0x20   :  { %803 = vmatprep.subr.mxu0 %v948_v0 }
  0x21   :  { %804 = vmatpush3.msra.mxu0 %v285_v41  ;;  %v594_v41 = vld [vmem:[%s1176_s5 + $0x60] sm:$0xff] }
  0x22   :  { %805 = vmatprep.subr.mxu0 %v948_v0 }
  0x23   :  { %806 = vmatpush3.msra.mxu0 %v284_v42  ;;  %v593_v42 = vld [vmem:[%s1176_s5 + $0x58] sm:$0xff] }
  0x24   :  { %810 = vmatprep.subr.mxu0 %v948_v0 }
  0xd4   :  { %v1032_v14 = vpop.f32.mrf.mxu0 }
  0xd6   :  { %v798_v15 = vpop.f32.mrf.mxu0 }
  0xdc   :  { %v1034_v16 = vpop.f32.mrf.mxu0 }
  0xde   :  { %v213_v17 = vpop.f32.mrf.mxu0 }
  0xdf   :  { %217 = vrot.lane.b32.xlu0 %v213_v17, %s950_s0 }
  0xe3   :  { %227 = vrot.lane.b32.xlu0 %v748_v18, %s950_s0  ;;  %v752_v18 = vld [vmem:[%s1177_s6] ss:$0 sm:$0xff] }
 0x151   :  { %v218_v19 = vpop.permute.xlu0 %217 }
 0x152   :  { %v220_v20 = vadd.f32 %v218_v19, %v1032_v14 }
 0x155   :  { %v228_v21 = vpop.permute.xlu0 %227 }
 0x156   :  { %v230_v22 = vadd.f32 %v228_v21, %v220_v20 }
 0x158   :  { %v232_v23 = vsel %vm231_vm4, %v230_v22, -inf }
 0x159   :  { %233 = vmax.xlane.f32.xlu1 %v232_v23 }
 0x1e2   :  { %v234_v24 = vpop.xlane.xlu1 %233 }
 0x1e3   :  { %v235_v25 = vsub.f32 %v230_v22, %v234_v24 }
 0x1e5   :  { %v236_v26 = vmul.f32 1.442695, %v235_v25 }
 0x1e7   :  { %885 = vpow2.f32 %v236_v26 }
 0x1f4   :  { %v886_v27 = vpop.eup %885 }
 0x1f5   :  { %239 = vrot.lane.b32.xlu1 %v886_v27, %s951_s16 }
 0x267   :  { %v240_v28 = vpop.permute.xlu1 %239 }
 0x268   :  { %v243_v29 = vsel %vm242_vm5, %v240_v28, 0.0 }
 0x269   :  { %244 = vadd.xlane.f32.xlu0 %v243_v29 }
 0x2f2   :  { %v245_v30 = vpop.xlane.xlu0 %244 }
 0x2f3   :  { %887 = vrcp.f32 %v245_v30 }
 0x300   :  { %v888_v34 = vpop.eup %887 }
 0x301   :  { %v1043_v35 = vmul.f32 %v888_v34, %v886_v27  ;;  %v499_v34 = vld [vmem:[#allocation4 + $0x48] sm:$0xff] }
 0x303   :  { %v251_v36 = vrot.slane %v1043_v35, %v250_v33  ;;  %v259_v39 = vrot.slane %v1043_v35, %v258_v37  ;;  %v500_v33 = vld [vmem:[#allocation4 + $0x70] sm:$0xff] }
 0x305   :  { %254 = vbcast.lane.b32.xlu1 %v251_v36, 288  ;;  %v498_v36 = vld [vmem:[#allocation4 + $0x20] sm:$0xff] }
 0x309   :  { %262 = vbcast.lane.b32.xlu1 %v259_v39, 288  ;;  %v596_v39 = vld [vmem:[%s1176_s5 + $0x70] sm:$0xff] }
 0x30a   :  { %835 = vmatpush3.msra.mxu1 %v596_v39 }
 0x30b   :  { %836 = vmatprep.subr.mxu1 %v948_v0 }
 0x30c   :  { %837 = vmatpush3.msra.mxu1 %v595_v40 }
 0x30d   :  { %50 = vrot.lane.b32.xlu1 %v48_v7, %s951_s16  ;;  %838 = vmatprep.subr.mxu1 %v948_v0 }
 0x30e   :  { %839 = vmatpush3.msra.mxu1 %v594_v41 }
 0x30f   :  { %840 = vmatprep.subr.mxu1 %v948_v0 }
 0x310   :  { %841 = vmatpush3.msra.mxu1 %v593_v42 }
 0x311   :  { %842 = vmatprep.subr.mxu1 %v948_v0 }
 0x377   :  { %v255_v44 = vpop.permute.xlu1 %254 }
 0x378   :  { %v266_v45 = vmul.f32 %v264_v43, %v255_v44  ;;  %v592_v43 = vld [vmem:[%s1176_s5 + $0x50] sm:$0xff] }
 0x379   :  { %843 = vmatpush3.msra.mxu1 %v592_v43 }
 0x37a   :  { %v268_v47 = vsel %vm141_vm3, %v266_v45, 0.0  ;;  %v591_v45 = vld [vmem:[%s1176_s5 + $0x48] sm:$0xff]  ;;  %844 = vmatprep.subr.mxu1 %v948_v0 }
 0x37b   :  { %v269_v48 = vrot.slane %v268_v47, 4  ;;  %v263_v49 = vpop.permute.xlu1 %262  ;;  %845 = vmatpush3.msra.mxu1 %v591_v45 }
 0x37c   :  { %v267_v50 = vmul.f32 %v265_v46, %v263_v49  ;;  %846 = vmatprep.subr.mxu1 %v948_v0  ;;  %v588_v49 = vld [vmem:[%s1176_s5 + $0x30] sm:$0xff] }
 0x37d   :  { %v270_v51 = vadd.f32 %v269_v48, %v268_v47  ;;  %v590_v47 = vld [vmem:[%s1176_s5 + $0x40] sm:$0xff]  ;;  %v589_v48 = vld [vmem:[%s1176_s5 + $0x38] sm:$0xff] }
 0x37e   :  { %v275_v52 = vsel %vm141_vm3, %v267_v50, 0.0  ;;  %847 = vmatpush3.msra.mxu1 %v590_v47  ;;  %v587_v50 = vld [vmem:[%s1176_s5 + $0x28] sm:$0xff] }
 0x37f   :  { %v271_v53 = vrot.slane %v270_v51, 2  ;;  %v276_v54 = vrot.slane %v275_v52, 4  ;;  %v51_v15 = vpop.permute.xlu1 %50  ;;  %848 = vmatprep.subr.mxu1 %v948_v0 }
 0x380   :  { %53 = vst.msk [vmem:[#allocation3] sm:$0x3] %vm46_vm2, %v51_v15  ;;  %849 = vmatpush3.msra.mxu1 %v589_v48 }
 0x381   :  { %v272_v55 = vadd.f32 %v271_v53, %v270_v51  ;;  %v277_v56 = vadd.f32 %v276_v54, %v275_v52  ;;  %850 = vmatprep.subr.mxu1 %v948_v0  ;;  %v586_v51 = vld [vmem:[%s1176_s5 + $0x20] sm:$0xff]  ;;  %v585_v52 = vld [vmem:[%s1176_s5 + $0x18] sm:$0xff]  ;;  %v584_v54 = vld [vmem:[%s1176_s5 + $0x10] sm:$0xff] }
 0x382   :  { %851 = vmatpush3.msra.mxu1 %v588_v49 }
 0x383   :  { %v273_v57 = vrot.slane %v272_v55, 1  ;;  %v278_v58 = vrot.slane %v277_v56, 2  ;;  %852 = vmatprep.subr.mxu1 %v948_v0 }
 0x384   :  { %853 = vmatpush3.msra.mxu1 %v587_v50 }
 0x385   :  { %v279_v59 = vadd.f32 %v278_v58, %v277_v56  ;;  %v274_v60 = vadd.f32 %v273_v57, %v272_v55  ;;  %854 = vmatprep.subr.mxu1 %v948_v0  ;;  %v583_v55 = vld [vmem:[%s1176_s5 + $0x8] sm:$0xff]  ;;  %v582_v56 = vld [vmem:[%s1176_s5] sm:$0xff]  ;;  %s953_s5 = smov 56  }
 0x386   :  { %855 = vmatpush3.msra.mxu1 %v586_v51  ;;  %v754_v57 = vld [vmem:[%s1177_s6 + $0x1] ss:$0 sm:$0xff] }
 0x387   :  { %v280_v61 = vrot.slane %v279_v59, 1  ;;  %v282_v63 = vmax.f32 %v274_v60, 0.0  ;;  %v56_v22 = vld [vmem:[#allocation3] sm:$0x3]  ;;  %856 = vmatprep.subr.mxu1 %v948_v0 }
 0x388   :  { %857 = vmatpush3.msra.mxu1 %v585_v52 }
 0x389   :  { %v281_v62 = vadd.f32 %v280_v61, %v279_v59  ;;  %858 = vmatprep.subr.mxu1 %v948_v0 }
 0x38a   :  { %859 = vmatpush3.msra.mxu1 %v584_v54 }
 0x38b   :  { %v283_v1 = vmax.f32 %v281_v62, 0.0  ;;  %860 = vmatprep.subr.mxu1 %v948_v0  ;;  %v756_v62 = vld [vmem:[%s1177_s6 + $0x4] ss:$0 sm:$0xff]  ;;  %s957_s6 = smov 4  }
 0x38c   :  { %861 = vmatpush3.msra.mxu1 %v583_v55 }
 0x38d   :  { %v291_v2 = vsel %vm290_vm6, %v283_v1, %v282_v63  ;;  %862 = vmatprep.subr.mxu1 %v948_v0 }
 0x38e   :  { %808 = vmatmul.mubr.msk.f32.vlgmr.msra.gmra.mxu0 %vm141_vm3, %v291_v2  ;;  %863 = vmatpush3.msra.mxu1 %v582_v56 }
 0x38f   :  { %818 = vmatprep.mubr.msk.f32.mxu0 %vm949_vm0, %v948_v0  ;;  %811 = vmatpush3.msra.mxu0 %v377_v3 }
 0x390   :  { %812 = vmatprep.subr.mxu0 %v948_v0 }
 0x391   :  { %813 = vmatpush3.msra.mxu0 %v376_v4 }
 0x392   :  { %814 = vmatprep.subr.mxu0 %v948_v0 }
 0x393   :  { %815 = vmatpush3.msra.mxu0 %v375_v5 }
 0x394   :  { %816 = vmatprep.subr.mxu0 %v948_v0 }
 0x395   :  { %817 = vmatpush3.msra.mxu0 %v374_v6 }
 0x396   :  { %821 = vmatprep.subr.mxu0 %v948_v0 }
 0x44e   :  { %v360_v8 = vpop.f32.mrf.mxu0 }
 0x44f   :  { %v364_v10 = vadd.f32 %v360_v8, %v1032_v14 }
 0x450   :  { %v809_v11 = vpop.f32.mrf.mxu0 }
 0x451   :  { %v372_v12 = vadd.f32 %v750_v9, %v364_v10 }
 0x453   :  { %v373_v13 = vmax.f32 %v372_v12, 0.0 }
 0x455   :  { %819 = vmatmul.mubr.msk.f32.vlgmr.msra.gmra.mxu0 %vm141_vm3, %v373_v13 }
 0x456   :  { %829 = vmatprep.mubr.msk.f32.mxu0 %vm949_vm0, %v948_v0  ;;  %822 = vmatpush3.msra.mxu0 %v501_v32 }
 0x457   :  { %823 = vmatprep.subr.mxu0 %v948_v0 }
 0x458   :  { %824 = vmatpush3.msra.mxu0 %v500_v33 }
 0x459   :  { %825 = vmatprep.subr.mxu0 %v948_v0 }
 0x45a   :  { %826 = vmatpush3.msra.mxu0 %v499_v34 }
 0x45b   :  { %827 = vmatprep.subr.mxu0 %v948_v0 }
 0x45c   :  { %828 = vmatpush3.msra.mxu0 %v498_v36 }
 0x515   :  { %v447_v17 = vpop.f32.mrf.mxu0 }
 0x516   :  { %v448_v19 = vadd.f32 %v447_v17, %v1034_v16 }
 0x517   :  { %v820_v20 = vpop.f32.mrf.mxu0 }
 0x518   :  { %v458_v14 = vadd.f32 %v752_v18, %v448_v19 }
 0x51a   :  { %889 = vtanh.f32 %v458_v14  ;;  %v753_v23 = vmul.f32 -1.442695, %v458_v14 }
 0x51c   :  { %891 = vpow2.f32 %v753_v23 }
 0x527   :  { %v890_v21 = vpop.eup %889 }
 0x528   :  { %472 = vrot.lane.b32.xlu1 %v890_v21, %s952_s25 }
 0x529   :  { %v892_v24 = vpop.eup %891 }
 0x52a   :  { %v462_v25 = vadd.f32 1.0, %v892_v24 }
 0x52c   :  { %467 = vrot.lane.b32.xlu1 %v56_v22, %s950_s0  ;;  %893 = vrcp.f32 %v462_v25 }
 0x539   :  { %v894_v26 = vpop.eup %893 }
 0x59a   :  { %v473_v27 = vpop.permute.xlu1 %472 }
 0x59b   :  { %v475_v28 = vmul.f32 %v894_v26, %v473_v27 }
 0x59d   :  { %477 = vrot.lane.b32.xlu0 %v475_v28, %s950_s0 }
 0x59e   :  { %v468_v16 = vpop.permute.xlu1 %467 }
 0x59f   :  { %v470_v29 = vmul.f32 %v894_v26, %v468_v16 }
 0x60f   :  { %v478_v30 = vpop.permute.xlu0 %477 }
 0x610   :  { %v1084_v31 = vadd.f32 %v478_v30, %v470_v29 }
 0x612   :  { %895 = vtanh.f32 %v1084_v31 }
 0x61f   :  { %v896_v37 = vpop.eup %895 }
 0x620   :  { %483 = vrot.lane.b32.xlu1 %v896_v37, %s952_s25 }
 0x692   :  { %v484_v44 = vpop.permute.xlu1 %483 }
 0x693   :  { %v486_v46 = vmul.f32 %v894_v26, %v484_v44 }
 0x695   :  { %488 = vrot.lane.b32.xlu1 %v486_v46, %s950_s0 }
 0x707   :  { %v489_v53 = vpop.permute.xlu1 %488 }
 0x708   :  { %492 = vst.msk [vmem:[#allocation2] sm:$0x3] %vm46_vm2, %v489_v53  ;;  %830 = vmatmul.mubr.msk.f32.vlgmr.msra.gmra.mxu0 %vm141_vm3, %v489_v53 }
 0x7c8   :  { %v577_v58 = vpop.f32.mrf.mxu0 }
 0x7c9   :  { %v578_v59 = vadd.f32 %v754_v57, %v577_v58 }
 0x7ca   :  { %v831_v60 = vpop.f32.mrf.mxu0 }
 0x7cb   :  { %v581_v61 = vmax.f32 %v578_v59, 0.0 }
 0x7cd   :  { %865 = vmatmul.mubr.f32.vlgmr.msra.gmra.mxu1 %v581_v61 }
 0x88d   :  { %v671_v63 = vpop.f32.mrf.mxu1 }
 0x88e   :  { %v672_v0 = vadd.f32 %v756_v62, %v671_v63 }
 0x88f   :  { %v866_v1 = vpop.f32.mrf.mxu1 }
 0x890   :  { %v676_v2 = vsel %vm675_vm7, %v672_v0, -inf }
 0x891   :  { %677 = vmax.xlane.f32.xlu1 %v676_v2 }
 0x8a2   :  { %717 = vrot.lane.b32.xlu1 %v486_v46, %s953_s5 }
 0x91a   :  { %v678_v3 = vpop.xlane.xlu1 %677 }
 0x91b   :  { %v679_v4 = vsub.f32 %v672_v0, %v678_v3 }
 0x91d   :  { %v680_v5 = vmul.f32 1.442695, %v679_v4 }
 0x91e   :  { %v718_v24 = vpop.permute.xlu1 %717 }
 0x91f   :  { %897 = vpow2.f32 %v680_v5 }
 0x92c   :  { %v898_v6 = vpop.eup %897 }
 0x92d   :  { %683 = vrot.lane.b32.xlu0 %v898_v6, %s954_s11 }
 0x931   :  { %687 = vrot.lane.b32.xlu0 %v898_v6, %s955_s12 }
 0x935   :  { %691 = vrot.lane.b32.xlu0 %v898_v6, %s956_s13 }
 0x99f   :  { %v684_v7 = vpop.permute.xlu0 %683 }
 0x9a0   :  { %v686_v9 = vadd.f32 %v898_v6, %v684_v7 }
 0x9a3   :  { %v688_v8 = vpop.permute.xlu0 %687 }
 0x9a4   :  { %v690_v10 = vadd.f32 %v688_v8, %v686_v9 }
 0x9a7   :  { %v692_v11 = vpop.permute.xlu0 %691 }
 0x9a8   :  { %v694_v12 = vadd.f32 %v692_v11, %v690_v10 }
 0x9aa   :  { %696 = vrot.lane.b32.xlu0 %v694_v12, %s957_s6 }
 0x9ae   :  { %699 = vrot.lane.b32.xlu0 %v694_v12, %s958_s14 }
 0x9b2   :  { %702 = vrot.lane.b32.xlu0 %v694_v12, %s959_s3 }
 0x9b6   :  { %714 = vrot.lane.b32.xlu0 %v1043_v35, %s960_s15 }
 0x9ba   :  { %720 = vrot.lane.b32.xlu0 %v1084_v31, %s961_s17 }
 0x9be   :  { %494 = vrot.lane.b32.xlu0 %v1084_v31, %s951_s16  ;;  %s962_s16 = smov [#allocation7]  }
 0x9bf   :  { %s737_s18 = sshll.u32 %s962_s16, 4  ;;  %s738_s18 = int_to_ptr.vmem [resolvable:$true] %s737_s18 }
 0x9c0   :  { %s921_s19 = scalar_lea.vmem %s738_s18, 32  ;;  %p926_p6 = scmp.lt.s32.totalorder %s738_s18, %s738_s18 }
 0x9c1   :  { %p922_p5 = scmp.ne.s32.totalorder %s738_s18, %s921_s19  ;;  %p927_p7 = scmp.lt.s32.totalorder %s921_s19, %s921_s19 }
 0x9c3   :  { %p928_p8 = por %p927_p7, %p926_p6 }
 0x9c5   :  { %p929_p9 = pnand %p928_p8, %p922_p5 }
 0xa1c   :  { %v697_v13 = vpop.permute.xlu0 %696 }
 0xa1d   :  { %v706_v17 = vsel %vm705_vm8, %v694_v12, %v697_v13 }
 0xa20   :  { %v700_v15 = vpop.permute.xlu0 %699 }
 0xa21   :  { %v708_v18 = vsel %vm707_vm9, %v706_v17, %v700_v15 }
 0xa24   :  { %v703_v19 = vpop.permute.xlu0 %702 }
 0xa25   :  { %v710_v20 = vsel %vm709_vm10, %v708_v18, %v703_v19 }
 0xa26   :  { %899 = vrcp.f32 %v710_v20 }
 0xa28   :  { %v715_v14 = vpop.permute.xlu0 %714 }
 0xa2c   :  { %v721_v21 = vpop.permute.xlu0 %720 }
 0xa30   :  { %v495_v22 = vpop.permute.xlu0 %494 }
 0xa31   :  { %497 = vst.msk [vmem:[#allocation3] sm:$0x3] %vm46_vm2, %v495_v22 }
 0xa33   :  { %v900_v35 = vpop.eup %899 }
 0xa34   :  { %v712_v23 = vmul.f32 %v900_v35, %v898_v6 }
 0xa36   :  { %v723_v25 = vsel %vm59_vm1, %v712_v23, %v715_v14 }
 0xa37   :  { %v725_v26 = vsel %vm724_vm11, %v723_v25, %v718_v24 }
 0xa38   :  { %v727_v27 = vsel %vm726_vm12, %v725_v26, %v721_v21 }
 0xa39   :  { %v729_v28 = vsel %vm728_vm13, %v727_v27, 0.0 }
 0xa3a   :  { %730 = vst [vmem:[#allocation7] sm:$0x3] %v729_v28 }
 0xa3b   :  { %932 = shalt.err (!%p929_p9)
}
 0xa3c   :  { %740 = dma.vmem_to_hbm [thread:$0]  %s738_s18, 32, %s1178_s7, [#allocation6]  }
 0xa3d   :  { %943 = dma.done.wait [#allocation6], 32  }
 0xa3e   :  { %944 = vsyncadd [#allocation6], 4294967264 }
 0xa3f   :  { %744 = vsyncpa [#allocation5], 1 }
 0xa40   :  { %745 = vsyncpa [#allocation6], 1 }

</bundles_post_ra>
